<compile_context>
chip_gen: v5e
topology: v5e:2x2
jax: 0.10.0
libtpu: 0.0.40
codegen_flags: <defaults>
</compile_context>

<pallas_src>
import math

import jax
import jax.numpy as jnp
from jax.experimental import pallas as pl
from jax.experimental.pallas import tpu as pltpu


# ----------------------------------------------------------------------------
# Glue: PyTorch-exact bilinear interpolation (align_corners=False, antialias=False)
# ----------------------------------------------------------------------------
def bilinear_resize_torch_like(x, out_h, out_w):
    """x: (B, N, in_h, in_w) -> (B, N, out_h, out_w), matches F.interpolate(..., 'bilinear')."""
    B, N, in_h, in_w = x.shape
    scale_h = in_h / out_h
    scale_w = in_w / out_w

    src_y = (jnp.arange(out_h, dtype=jnp.float32) + 0.5) * scale_h - 0.5
    src_x = (jnp.arange(out_w, dtype=jnp.float32) + 0.5) * scale_w - 0.5
    src_y = jnp.maximum(src_y, 0.0)
    src_x = jnp.maximum(src_x, 0.0)

    y0 = jnp.floor(src_y).astype(jnp.int32)
    x0 = jnp.floor(src_x).astype(jnp.int32)
    y0 = jnp.minimum(y0, in_h - 1)
    x0 = jnp.minimum(x0, in_w - 1)
    y1 = jnp.minimum(y0 + 1, in_h - 1)
    x1 = jnp.minimum(x0 + 1, in_w - 1)

    wy = (src_y - y0.astype(jnp.float32))[None, None, :, None]  # (1,1,out_h,1)
    wx = (src_x - x0.astype(jnp.float32))[None, None, None, :]  # (1,1,1,out_w)

    rows0 = x[:, :, y0, :]      # (B, N, out_h, in_w)
    rows1 = x[:, :, y1, :]
    v00 = rows0[:, :, :, x0]    # (B, N, out_h, out_w)
    v01 = rows0[:, :, :, x1]
    v10 = rows1[:, :, :, x0]
    v11 = rows1[:, :, :, x1]

    top = v00 * (1.0 - wx) + v01 * wx
    bot = v10 * (1.0 - wx) + v11 * wx
    return top * (1.0 - wy) + bot * wy


# ----------------------------------------------------------------------------
# Pallas kernel: streamed weighted sum over instances (weights pre-normalized)
# ----------------------------------------------------------------------------
def _fuse_kernel(ca_ref, w_ref, out_ref):
    # ca_ref:  (N1, THW, C)  VMEM, native dtype (f32 or bf16)
    # w_ref:   (THW, N1)     VMEM, f32, pre-normalized; hw on SUBLANES so each
    #                        column broadcasts against (THW, C) with no relayout
    # out_ref: (THW, C)      VMEM, out dtype (f32 default)
    n1 = ca_ref.shape[0]
    acc = ca_ref[0].astype(jnp.float32) * w_ref[:, 0:1]
    for n in range(1, n1):                  # static unroll; N1 is small
        acc = acc + ca_ref[n].astype(jnp.float32) * w_ref[:, n:n + 1]
    out_ref[...] = acc.astype(out_ref.dtype)
    # TODO(synk): if instance_num grows (N1 >~ 16), move N1 onto an innermost
    # "arbitrary" grid axis with a VMEM f32 accumulator (init/store via pl.when)
    # so the per-step VMEM footprint stays independent of N1.


def _round_up(x, m):
    return ((x + m - 1) // m) * m


def _vmem_capacity_bytes():
    """Physical VMEM per TensorCore; conservative 64 MiB fallback (v7x)."""
    try:
        info = pltpu.get_tpu_info()
        cap = getattr(info, "vmem_capacity_bytes", None)
        if cap:
            return int(cap)
    except Exception:
        pass
    return 64 * 1024 * 1024


def _pick_hw_tile(HW, N1, C, ca_itemsize, out_itemsize, vmem_budget_bytes):
    """Largest HW (sublane) tile whose double-buffered working set fits the budget."""
    c_pad = _round_up(C, 128)
    # dtype-aware sublane packing: 8 rows f32, 16 bf16, 32 int8/fp8
    quantum = {1: 32, 2: 16}.get(ca_itemsize, 8)

    def step_bytes(t):
        ca_buf = N1 * _round_up(t, quantum) * c_pad * ca_itemsize
        w_buf = _round_up(t, 8) * 128 * 4          # (t, N1) tile, N1 lane-padded to 128
        out_buf = _round_up(t, 8) * c_pad * out_itemsize
        return 2 * (ca_buf + w_buf + out_buf)      # double buffered

    cap_rows = 1024   # measured: 512 rows -> 85% of HBM roofline, 1024 -> 86%
    if HW <= cap_rows and step_bytes(HW) <= vmem_budget_bytes:
        return HW     # single hw tile per batch; full-dim block is always legal

    best = quantum
    t = quantum
    limit = min(HW, cap_rows)
    while t <= limit:
        if step_bytes(t) <= vmem_budget_bytes:
            best = t
        t += quantum

    # Prefer an exact divisor of HW near `best` (avoids a remainder tile);
    # otherwise use cdiv grid and let Pallas clip the last tile.
    for d in range(best, best // 2, -quantum):
        if HW % d == 0:
            return d
    return best


def naive_fuser_pallas(ca_x, guidance_mask, other_info, out_dtype=None):
    """ca_x: (B, N+1, HW, C) (f32 or bf16); guidance_mask: (B, N, full_H, full_W)."""
    full_H = other_info["height"]
    full_W = other_info["width"]
    B, N1, HW, C = ca_x.shape
    instance_num = guidance_mask.shape[1]
    assert N1 == instance_num + 1

    # NOTE: int(sqrt(...)) can floor for non-square H/W ratios (same behaviour
    # as the PyTorch module); the assert below catches it loudly.
    down_scale = int(math.sqrt(full_H * full_W // HW))
    H = full_H // down_scale
    W = full_W // down_scale
    assert H * W == HW

    out_dtype = jnp.float32 if out_dtype is None else jnp.dtype(out_dtype)

    # ---- tiny glue in plain JAX: resize, concat, pre-normalize weights ----
    gm = bilinear_resize_torch_like(guidance_mask.astype(jnp.float32), H, W)
    gm = jnp.concatenate([jnp.ones((B, 1, H, W), jnp.float32), gm * 10.0], axis=1)
    gm = gm.reshape(B, N1, HW)                                          # (B, N+1, HW)
    w = gm / (jnp.sum(gm, axis=1, keepdims=True) + jnp.float32(1e-6))
    # (B, HW, N1): hw lands on the sublane axis in-kernel, so the per-instance
    # weight column broadcasts against the (thw, C) activation tile without a
    # relayout and the weight VMEM tile is thw*128*4 bytes (not N1*thw*128*4).
    w = jnp.transpose(w, (0, 2, 1))

    ca_itemsize = jnp.dtype(ca_x.dtype).itemsize
    out_itemsize = jnp.dtype(out_dtype).itemsize

    vmem_cap = _vmem_capacity_bytes()
    tile_budget = int(vmem_cap * 0.45)   # ~28 MiB on v7x (64 MiB), ~57 MiB on v5e/v6e (128 MiB)
    vmem_limit = int(vmem_cap * 0.75)    # ~48 MiB on v7x, ~96 MiB on v5e/v6e

    thw = _pick_hw_tile(HW, N1, C, ca_itemsize, out_itemsize, tile_budget)
    num_hw_tiles = pl.cdiv(HW, thw)

    out = pl.pallas_call(
        _fuse_kernel,
        out_shape=jax.ShapeDtypeStruct((B, HW, C), out_dtype),
        grid_spec=pltpu.PrefetchScalarGridSpec(
            num_scalar_prefetch=0,
            grid=(B, num_hw_tiles),
            in_specs=[
                pl.BlockSpec((None, N1, thw, C), lambda b, h: (b, 0, h, 0)),
                pl.BlockSpec((None, thw, N1), lambda b, h: (b, h, 0)),
            ],
            out_specs=pl.BlockSpec((None, thw, C), lambda b, h: (b, h, 0)),
        ),
        compiler_params=pltpu.CompilerParams(
            dimension_semantics=("parallel", "parallel"),
            vmem_limit_bytes=vmem_limit,
        ),
        cost_estimate=pl.CostEstimate(
            flops=2 * B * N1 * HW * C,
            transcendentals=0,
            bytes_accessed=(B * N1 * HW * C * ca_itemsize   # ca_x read (native dtype)
                            + B * HW * N1 * 4               # weights read (lane-dense)
                            + B * HW * C * out_itemsize),   # output write
        ),
    )(ca_x, w)
    # TODO(synk): for production C < 128, a wrapper-side (HW*C/128, 128)
    # lane-dense re-layout of ca_x / out (with in-kernel weight expansion)
    # would turn the masked partial output stores into full 128-lane vst rows.
    return out


# Pure-JAX reference (original formulation) for correctness checks.
def naive_fuser_ref(ca_x, guidance_mask, other_info):
    full_H = other_info["height"]
    full_W = other_info["width"]
    B, N1, HW, C = ca_x.shape
    down_scale = int(math.sqrt(full_H * full_W // HW))
    H = full_H // down_scale
    W = full_W // down_scale
    gm = bilinear_resize_torch_like(guidance_mask.astype(jnp.float32), H, W)
    gm = jnp.concatenate([jnp.ones((B, 1, H, W), jnp.float32), gm * 10.0], axis=1)
    gm = gm.reshape(B, N1, HW, 1)
    ca = ca_x.astype(jnp.float32)
    return (ca * gm).sum(axis=1) / (gm.sum(axis=1) + 1e-6)


if __name__ == "__main__":
    # Small shapes consistent with the module:
    #   B=2, instance_num=3 -> ca_x has N+1=4 "paths", full 16x16 image,
    #   latent HW=64 (down_scale=2 -> H=W=8), hidden C=32.
    B, instance_num, C = 2, 3, 32
    full_H = full_W = 16
    H = W = 8
    HW = H * W

    key = jax.random.PRNGKey(0)
    k1, k2 = jax.random.split(key)
    ca_x = jax.random.normal(k1, (B, instance_num + 1, HW, C), dtype=jnp.float32)
    guidance_mask = jax.random.uniform(k2, (B, instance_num, full_H, full_W),
                                       dtype=jnp.float32)
    other_info = {"height": full_H, "width": full_W}

    # f32 path
    out = naive_fuser_pallas(ca_x, guidance_mask, other_info)
    out = jax.block_until_ready(out)
    ref = naive_fuser_ref(ca_x, guidance_mask, other_info)
    assert out.shape == (B, HW, C)
    assert jnp.allclose(out, ref, atol=1e-5, rtol=1e-5)

    # bf16 activations path (native dtype on the wire, f32 accumulation in-kernel)
    ca_bf16 = ca_x.astype(jnp.bfloat16)
    out_bf = naive_fuser_pallas(ca_bf16, guidance_mask, other_info)
    out_bf = jax.block_until_ready(out_bf)
    ref_bf = naive_fuser_ref(ca_bf16, guidance_mask, other_info)
    assert jnp.allclose(out_bf, ref_bf, atol=1e-4, rtol=1e-4)

    # optional bf16 output path (gated; changes returned dtype vs the f32 ref)
    out_bf_out = naive_fuser_pallas(ca_bf16, guidance_mask, other_info,
                                    out_dtype=jnp.bfloat16)
    out_bf_out = jax.block_until_ready(out_bf_out)
    assert out_bf_out.dtype == jnp.bfloat16
    assert jnp.allclose(out_bf_out.astype(jnp.float32), ref_bf,
                        atol=3e-2, rtol=3e-2)

    print("KERNEL_OK")
</pallas_src>

<mosaic_0001>
module attributes {stable_mosaic.version = 11 : i64} {
  func.func @_fuse_kernel(%arg0: i32, %arg1: i32, %arg2: memref<1x4x64x32xf32, #tpu.memory_space<vmem>>, %arg3: memref<1x64x4xf32, #tpu.memory_space<vmem>>, %arg4: memref<1x64x32xf32, #tpu.memory_space<vmem>>) attributes {dimension_semantics = [#tpu.dimension_semantics<parallel>, #tpu.dimension_semantics<parallel>], iteration_bounds = array<i64: 2, 1>, scalar_prefetch = 0 : i64, scratch_operands = 0 : i64, tpu.core_type = #tpu.core_type<tc>, window_params = [{transform_indices = @transform_0, window_bounds = array<i64: 1, 4, 64, 32>}, {transform_indices = @transform_1, window_bounds = array<i64: 1, 64, 4>}, {transform_indices = @transform_2, window_bounds = array<i64: 1, 64, 32>}]} {
    %c0 = arith.constant 0 : index
    %c0_0 = arith.constant 0 : index
    %c0_1 = arith.constant 0 : index
    %c0_2 = arith.constant 0 : index
    %0 = vector.load %arg2[%c0, %c0_0, %c0_1, %c0_2] : memref<1x4x64x32xf32, #tpu.memory_space<vmem>>, vector<1x1x64x32xf32>
    %1 = vector.shape_cast %0 : vector<1x1x64x32xf32> to vector<64x32xf32>
    %c0_3 = arith.constant 0 : index
    %c0_4 = arith.constant 0 : index
    %c0_5 = arith.constant 0 : index
    %2 = vector.load %arg3[%c0_3, %c0_4, %c0_5] : memref<1x64x4xf32, #tpu.memory_space<vmem>>, vector<1x64x1xf32>
    %3 = vector.shape_cast %2 : vector<1x64x1xf32> to vector<64x1xf32>
    %4 = vector.broadcast %3 : vector<64x1xf32> to vector<64x32xf32>
    %5 = arith.mulf %1, %4 : vector<64x32xf32>
    %c0_6 = arith.constant 0 : index
    %c1 = arith.constant 1 : index
    %c0_7 = arith.constant 0 : index
    %c0_8 = arith.constant 0 : index
    %6 = vector.load %arg2[%c0_6, %c1, %c0_7, %c0_8] : memref<1x4x64x32xf32, #tpu.memory_space<vmem>>, vector<1x1x64x32xf32>
    %7 = vector.shape_cast %6 : vector<1x1x64x32xf32> to vector<64x32xf32>
    %c0_9 = arith.constant 0 : index
    %c0_10 = arith.constant 0 : index
    %c1_11 = arith.constant 1 : index
    %8 = vector.load %arg3[%c0_9, %c0_10, %c1_11] : memref<1x64x4xf32, #tpu.memory_space<vmem>>, vector<1x64x1xf32>
    %9 = vector.shape_cast %8 : vector<1x64x1xf32> to vector<64x1xf32>
    %10 = vector.broadcast %9 : vector<64x1xf32> to vector<64x32xf32>
    %11 = arith.mulf %7, %10 : vector<64x32xf32>
    %12 = arith.addf %5, %11 : vector<64x32xf32>
    %c0_12 = arith.constant 0 : index
    %c2 = arith.constant 2 : index
    %c0_13 = arith.constant 0 : index
    %c0_14 = arith.constant 0 : index
    %13 = vector.load %arg2[%c0_12, %c2, %c0_13, %c0_14] : memref<1x4x64x32xf32, #tpu.memory_space<vmem>>, vector<1x1x64x32xf32>
    %14 = vector.shape_cast %13 : vector<1x1x64x32xf32> to vector<64x32xf32>
    %c0_15 = arith.constant 0 : index
    %c0_16 = arith.constant 0 : index
    %c2_17 = arith.constant 2 : index
    %15 = vector.load %arg3[%c0_15, %c0_16, %c2_17] : memref<1x64x4xf32, #tpu.memory_space<vmem>>, vector<1x64x1xf32>
    %16 = vector.shape_cast %15 : vector<1x64x1xf32> to vector<64x1xf32>
    %17 = vector.broadcast %16 : vector<64x1xf32> to vector<64x32xf32>
    %18 = arith.mulf %14, %17 : vector<64x32xf32>
    %19 = arith.addf %12, %18 : vector<64x32xf32>
    %c0_18 = arith.constant 0 : index
    %c3 = arith.constant 3 : index
    %c0_19 = arith.constant 0 : index
    %c0_20 = arith.constant 0 : index
    %20 = vector.load %arg2[%c0_18, %c3, %c0_19, %c0_20] : memref<1x4x64x32xf32, #tpu.memory_space<vmem>>, vector<1x1x64x32xf32>
    %21 = vector.shape_cast %20 : vector<1x1x64x32xf32> to vector<64x32xf32>
    %c0_21 = arith.constant 0 : index
    %c0_22 = arith.constant 0 : index
    %c3_23 = arith.constant 3 : index
    %22 = vector.load %arg3[%c0_21, %c0_22, %c3_23] : memref<1x64x4xf32, #tpu.memory_space<vmem>>, vector<1x64x1xf32>
    %23 = vector.shape_cast %22 : vector<1x64x1xf32> to vector<64x1xf32>
    %24 = vector.broadcast %23 : vector<64x1xf32> to vector<64x32xf32>
    %25 = arith.mulf %21, %24 : vector<64x32xf32>
    %26 = arith.addf %19, %25 : vector<64x32xf32>
    %c0_24 = arith.constant 0 : index
    %c0_25 = arith.constant 0 : index
    %c0_26 = arith.constant 0 : index
    %27 = vector.load %arg4[%c0_24, %c0_25, %c0_26] : memref<1x64x32xf32, #tpu.memory_space<vmem>>, vector<1x64x32xf32>
    %28 = vector.shape_cast %27 : vector<1x64x32xf32> to vector<64x32xf32>
    %29 = vector.shape_cast %26 : vector<64x32xf32> to vector<1x64x32xf32>
    tpu.vector_store %arg4[%c0_24, %c0_25, %c0_26], %29 {strides = array<i32>} : memref<1x64x32xf32, #tpu.memory_space<vmem>>, vector<1x64x32xf32>,
    return
  }
  func.func @transform_0(%arg0: i32, %arg1: i32) -> (i32, i32, i32, i32) {
    %c0_i32 = arith.constant 0 : i32
    %c0_i32_0 = arith.constant 0 : i32
    %c0_i32_1 = arith.constant 0 : i32
    return %arg0, %c0_i32, %arg1, %c0_i32_0 : i32, i32, i32, i32
  }
  func.func @transform_1(%arg0: i32, %arg1: i32) -> (i32, i32, i32) {
    %c0_i32 = arith.constant 0 : i32
    %c0_i32_0 = arith.constant 0 : i32
    return %arg0, %arg1, %c0_i32 : i32, i32, i32
  }
  func.func @transform_2(%arg0: i32, %arg1: i32) -> (i32, i32, i32) {
    %c0_i32 = arith.constant 0 : i32
    %c0_i32_0 = arith.constant 0 : i32
    return %arg0, %arg1, %c0_i32 : i32, i32, i32
  }
}

</mosaic_0001>

<bundles_post_ra>
// kernel: tpu_custom_call.1
= control target key start
LH: loop header
LB: loop body
LE: loop exit
PB: predicated region body
PF: predicated region fallthrough
CT: control target
= control target key end

     0   :  { %s691_s9 = smov 0   ;;  %s693_s10 = smov 0   ;;  %s793_s0 = inlined_call_operand.vmem [shape: f32[2,4,64,32], index: 0, kind: input, shape index: {}]   ;;  %s794_s1 = inlined_call_operand.vmem [shape: f32[2,64,4], index: 1, kind: input, shape index: {}]   ;;  %s795_s2 = inlined_call_operand.vmem [shape: f32[2,64,32], index: 2, kind: output, shape index: {}]  }
   0x1   :  { %s695_s11 = smov 0  }
   0x2 LB: > { %s24_s12 = sadd.s32 1, %s666_s10  ;;  %p572_p0 = scmp.ge.s32.totalorder %s670_s11, 1  ;;  %s670_s11 = sphi %s695_s11, %s12_s11   ;;  %s666_s10 = sphi %s693_s10, %s797_s10   ;;  %s662_s9 = sphi %s691_s9, %s796_s9  }
   0x3   : > { %p26_p1 = scmp.ge.s32.totalorder %s24_s12, 2  ;;  %p150_p2 = scmp.lt.s32.totalorder %s670_s11, 3 }
   0x5   : > { %s799_s12 = smov (%p26_p1, %s24_s12), 0  ;;  %p151_p3 = pnand %p572_p0, %p150_p2 }
   0x6   : > { %p190_p4 = scmp.lt.s32.totalorder (!%p151_p3), %s662_s9, 1 }
   0x7   : > { %154 = sbr.rel (%p151_p3) target bundleno = 227 (0xe3), region = 28 }
   0xc   : > { %v672_v0 = vmov 0   ;;  %s801_s9 = smov (!%p190_p4, %s662_s9), 1  ;;  %v673_v9 = vmov 1   ;;  %v674_v10 = vmov 2   ;;  %v675_v11 = vmov 3  }
   0xd   : > { %638 = vset.pattern.permute.xlu2 %v672_v0  ;;  %637 = vset.pattern.permute.xlu1 %v672_v0  ;;  %s606_s13 = sshll.u32 %s801_s9, 6  ;;  %s605_s17 = sshll.u32 %s801_s9, 8  ;;  %vm454_vm0 = vcmask 261120  }
   0xe   : > { %636 = vset.pattern.permute.xlu0 %v672_v0  ;;  %s207_s16 = scalar_lea.vmem %s794_s1, %s606_s13  ;;  %s721_s20 = scalar_lea.vmem %s793_s0, %s605_s17 }
   0xf   : > { %v231_v1 = vld [vmem:[%s207_s16 + $0x20] sm:$0xff]  ;;  %v229_v2 = vld [vmem:[%s207_s16 + $0x10] sm:$0xff]  ;;  %v232_v4 = vld [vmem:[%s207_s16 + $0x28] sm:$0xff]  ;;  %s747_s23 = scalar_lea.vmem %s795_s2, %s606_s13 }
  0x10   : > { %v227_v3 = vld [vmem:[%s207_s16] sm:$0xff]  ;;  %257 = vperm.xlu2 %638, %v231_v1   ;;  %247 = vperm.xlu1 %637, %v229_v2   ;;  %v230_v5 = vld [vmem:[%s207_s16 + $0x18] sm:$0xff]  ;;  %v228_v6 = vld [vmem:[%s207_s16 + $0x8] sm:$0xff] }
  0x11   : > { %237 = vperm.xlu0 %636, %v227_v3   ;;  %v234_v7 = vld [vmem:[%s207_s16 + $0x38] sm:$0xff]  ;;  %v233_v8 = vld [vmem:[%s207_s16 + $0x30] sm:$0xff]  ;;  %v223_v12 = vld [vmem:[%s721_s20 + $0x20] sm:$0xff] }
  0x12   : > { %v224_v15 = vld [vmem:[%s721_s20 + $0x28] sm:$0xff]  ;;  %v221_v19 = vld [vmem:[%s721_s20 + $0x10] sm:$0xff]  ;;  %v226_v30 = vld [vmem:[%s721_s20 + $0x38] sm:$0xff] }
  0x13   : > { %v584_v25 = vld [vmem:[%s721_s20 + $0x68] sm:$0xff]  ;;  %v581_v35 = vld [vmem:[%s721_s20 + $0x50] sm:$0xff]  ;;  %v583_v41 = vld [vmem:[%s721_s20 + $0x60] sm:$0xff] }
  0x14   : > { %v592_v43 = vld [vmem:[%s721_s20 + $0xa8] sm:$0xff]  ;;  %v579_v44 = vld [vmem:[%s721_s20 + $0x40] sm:$0xff]  ;;  %v586_v55 = vld [vmem:[%s721_s20 + $0x78] sm:$0xff] }
  0x15   : > { %v219_v45 = vld [vmem:[%s721_s20] sm:$0xff]  ;;  %v582_v62 = vld [vmem:[%s721_s20 + $0x58] sm:$0xff] }
  0x16   : > { %v587_v53 = vld [vmem:[%s721_s20 + $0x80] sm:$0xff]  ;;  %v222_v63 = vld [vmem:[%s721_s20 + $0x18] sm:$0xff] }
  0x17   : > { %v595_v60 = vld [vmem:[%s721_s20 + $0xc0] sm:$0xff] }
  0x18   : > { %262 = vperm.xlu2 %638, %v232_v4   ;;  %252 = vperm.xlu1 %637, %v230_v5  }
  0x19   : > { %242 = vperm.xlu0 %636, %v228_v6  }
  0x20   : > { %639 = vset.pattern.permute.xlu2 %v673_v9  ;;  %272 = vperm.xlu1 %637, %v234_v7  }
  0x21   : > { %267 = vperm.xlu0 %636, %v233_v8   ;;  %293 = vperm.xlu2 %639, %v227_v3  }
  0x28   : > { %641 = vset.pattern.permute.xlu1 %v673_v9 }
  0x29   : > { %640 = vset.pattern.permute.xlu0 %v673_v9  ;;  %301 = vperm.xlu1 %641, %v229_v2  }
  0x2a   : > { %305 = vperm.xlu2 %639, %v230_v5   ;;  %297 = vperm.xlu0 %640, %v228_v6  }
  0x31   : > { %309 = vperm.xlu1 %641, %v231_v1  }
  0x32   : > { %313 = vperm.xlu2 %639, %v232_v4   ;;  %317 = vperm.xlu0 %640, %v233_v8  }
  0x39   : > { %321 = vperm.xlu1 %641, %v234_v7  }
  0x3a   : > { %642 = vset.pattern.permute.xlu2 %v674_v10  ;;  %643 = vset.pattern.permute.xlu0 %v674_v10 }
  0x3b   : > { %350 = vperm.xlu2 %642, %v227_v3   ;;  %354 = vperm.xlu0 %643, %v228_v6  }
  0x41   : > { %644 = vset.pattern.permute.xlu1 %v674_v10 }
  0x42   : > { %358 = vperm.xlu1 %644, %v229_v2  }
  0x43   : > { %362 = vperm.xlu2 %642, %v230_v5   ;;  %374 = vperm.xlu0 %643, %v233_v8  }
  0x4a   : > { %366 = vperm.xlu1 %644, %v231_v1  }
  0x4b   : > { %370 = vperm.xlu2 %642, %v232_v4   ;;  %646 = vset.pattern.permute.xlu0 %v675_v11 }
  0x4c   : > { %411 = vperm.xlu0 %646, %v228_v6  }
  0x52   : > { %378 = vperm.xlu1 %644, %v234_v7  }
  0x53   : > { %645 = vset.pattern.permute.xlu2 %v675_v11 }
  0x54   : > { %407 = vperm.xlu2 %645, %v227_v3   ;;  %431 = vperm.xlu0 %646, %v233_v8   ;;  %v589_v8 = vld [vmem:[%s721_s20 + $0x90] sm:$0xff] }
  0x5a   : > { %647 = vset.pattern.permute.xlu1 %v675_v11  ;;  %v598_v11 = vld [vmem:[%s721_s20 + $0xd8] sm:$0xff] }
  0x5b   : > { %415 = vperm.xlu1 %647, %v229_v2  }
  0x5c   : > { %419 = vperm.xlu2 %645, %v230_v5  }
  0x63   : > { %423 = vperm.xlu1 %647, %v231_v1  }
  0x64   : > { %427 = vperm.xlu2 %645, %v232_v4   ;;  %v590_v4 = vld [vmem:[%s721_s20 + $0x98] sm:$0xff] }
  0x6a   : > { %v258_v13 = vpop.permute.xlu2 %257 }
  0x6b   : > { %v279_v14 = vmul.f32 %v258_v13, %v223_v12  ;;  %435 = vperm.xlu1 %647, %v234_v7  }
  0x72   : > { %v263_v16 = vpop.permute.xlu2 %262 }
  0x73   : > { %v280_v17 = vmul.f32 %v263_v16, %v224_v15  ;;  %v220_v15 = vld [vmem:[%s721_s20 + $0x8] sm:$0xff] }
  0x74   : > { %v580_v16 = vld [vmem:[%s721_s20 + $0x48] sm:$0xff] }
  0x7b   : > { %v294_v18 = vpop.permute.xlu2 %293 }
  0x7c   : > { %v324_v51 = vmul.f32 %v579_v44, %v294_v18 }
  0x82   : > { %v248_v20 = vpop.permute.xlu1 %247 }
  0x83   : > { %v277_v21 = vmul.f32 %v248_v20, %v221_v19  ;;  %v238_v22 = vpop.permute.xlu0 %237 }
  0x84   : > { %v306_v23 = vpop.permute.xlu2 %305  ;;  %v275_v52 = vmul.f32 %v238_v22, %v219_v45  ;;  %v594_v45 = vld [vmem:[%s721_s20 + $0xb8] sm:$0xff] }
  0x85   : > { %v327_v5 = vmul.f32 %v582_v62, %v306_v23 }
  0x86   : > { %v332_v56 = vadd.f32 %v324_v51, %v275_v52 }
  0x8a   : > { %v253_v24 = vpop.permute.xlu1 %252 }
  0x8b   : > { %v727_v26 = vpop.permute.xlu0 %242  ;;  %v278_v6 = vmul.f32 %v253_v24, %v222_v63 }
  0x8c   : > { %v314_v27 = vpop.permute.xlu2 %313  ;;  %v276_v22 = vmul.f32 %v727_v26, %v220_v15 }
  0x8d   : > { %v329_v28 = vmul.f32 %v584_v25, %v314_v27  ;;  %v335_v12 = vadd.f32 %v327_v5, %v278_v6  ;;  %v591_v25 = vld [vmem:[%s721_s20 + $0xa0] sm:$0xff] }
  0x8f   : > { %v337_v29 = vadd.f32 %v329_v28, %v280_v17 }
  0x92   : > { %v273_v31 = vpop.permute.xlu1 %272 }
  0x93   : > { %v282_v32 = vmul.f32 %v273_v31, %v226_v30  ;;  %v730_v33 = vpop.permute.xlu0 %267  ;;  %v596_v30 = vld [vmem:[%s721_s20 + $0xc8] sm:$0xff] }
  0x95   : > { %v351_v34 = vpop.permute.xlu2 %350 }
  0x96   : > { %v381_v57 = vmul.f32 %v587_v53, %v351_v34  ;;  %v585_v34 = vld [vmem:[%s721_s20 + $0x70] sm:$0xff] }
  0x98   : > { %v389_v2 = vadd.f32 %v381_v57, %v332_v56 }
  0x9b   : > { %v302_v36 = vpop.permute.xlu1 %301 }
  0x9c   : > { %v326_v37 = vmul.f32 %v581_v35, %v302_v36  ;;  %v298_v38 = vpop.permute.xlu0 %297 }
  0x9d   : > { %v363_v39 = vpop.permute.xlu2 %362  ;;  %v325_v23 = vmul.f32 %v580_v16, %v298_v38 }
  0x9e   : > { %v334_v40 = vadd.f32 %v326_v37, %v277_v21  ;;  %v384_v9 = vmul.f32 %v590_v4, %v363_v39  ;;  %v588_v21 = vld [vmem:[%s721_s20 + $0x88] sm:$0xff] }
  0x9f   : > { %v333_v31 = vadd.f32 %v325_v23, %v276_v22 }
  0xa0   : > { %v392_v18 = vadd.f32 %v384_v9, %v335_v12 }
  0xa3   : > { %v310_v42 = vpop.permute.xlu1 %309 }
  0xa4   : > { %v328_v46 = vmul.f32 %v583_v41, %v310_v42  ;;  %v318_v47 = vpop.permute.xlu0 %317  ;;  %v593_v41 = vld [vmem:[%s721_s20 + $0xb0] sm:$0xff] }
  0xa5   : > { %v371_v48 = vpop.permute.xlu2 %370  ;;  %v330_v42 = vmul.f32 %v585_v34, %v318_v47 }
  0xa6   : > { %v336_v49 = vadd.f32 %v328_v46, %v279_v14  ;;  %v386_v50 = vmul.f32 %v592_v43, %v371_v48 }
  0xa8   : > { %v394_v54 = vadd.f32 %v386_v50, %v337_v29  ;;  %v600_v29 = vld [vmem:[%s721_s20 + $0xe8] sm:$0xff]  ;;  %v601_v50 = vld [vmem:[%s721_s20 + $0xf0] sm:$0xff] }
  0xab   : > { %v322_v58 = vpop.permute.xlu1 %321 }
  0xac   : > { %v331_v59 = vmul.f32 %v586_v55, %v322_v58 }
  0xad   : > { %v355_v61 = vpop.permute.xlu0 %354 }
  0xae   : > { %v339_v0 = vadd.f32 %v331_v59, %v282_v32  ;;  %v408_v1 = vpop.permute.xlu2 %407  ;;  %v382_v27 = vmul.f32 %v588_v21, %v355_v61 }
  0xaf   : > { %v438_v3 = vmul.f32 %v595_v60, %v408_v1  ;;  %v599_v60 = vld [vmem:[%s721_s20 + $0xe0] sm:$0xff]  ;;  %v602_v1 = vld [vmem:[%s721_s20 + $0xf8] sm:$0xff] }
  0xb0   : > { %v390_v26 = vadd.f32 %v382_v27, %v333_v31 }
  0xb1   : > { %v446_v7 = vadd.f32 %v438_v3, %v389_v2 }
  0xb3   : > { %455 = vst.msk [vmem:[%s747_s23] sm:$0xff] %vm454_vm0, %v446_v7 }
  0xb4   : > { %v359_v10 = vpop.permute.xlu1 %358 }
  0xb5   : > { %v383_v13 = vmul.f32 %v589_v8, %v359_v10  ;;  %v375_v14 = vpop.permute.xlu0 %374 }
  0xb6   : > { %v420_v17 = vpop.permute.xlu2 %419  ;;  %v387_v48 = vmul.f32 %v593_v41, %v375_v14 }
  0xb7   : > { %v391_v19 = vadd.f32 %v383_v13, %v334_v40  ;;  %v441_v20 = vmul.f32 %v598_v11, %v420_v17  ;;  %v225_v40 = vld [vmem:[%s721_s20 + $0x30] sm:$0xff] }
  0xb8   : > { %v281_v46 = vmul.f32 %v730_v33, %v225_v40  ;;  %v597_v33 = vld [vmem:[%s721_s20 + $0xd0] sm:$0xff] }
  0xb9   : > { %v449_v24 = vadd.f32 %v441_v20, %v392_v18 }
  0xba   : > { %v338_v51 = vadd.f32 %v330_v42, %v281_v46 }
  0xbb   : > { %458 = vst.msk [vmem:[%s747_s23 + $0x18] sm:$0xff] %vm454_vm0, %v449_v24 }
  0xbc   : > { %v367_v28 = vpop.permute.xlu1 %366  ;;  %v395_v53 = vadd.f32 %v387_v48, %v338_v51 }
  0xbd   : > { %v385_v32 = vmul.f32 %v591_v25, %v367_v28 }
  0xbe   : > { %v428_v35 = vpop.permute.xlu2 %427  ;;  %v412_v36 = vpop.permute.xlu0 %411 }
  0xbf   : > { %v393_v37 = vadd.f32 %v385_v32, %v336_v49  ;;  %v443_v38 = vmul.f32 %v600_v29, %v428_v35  ;;  %v439_v39 = vmul.f32 %v596_v30, %v412_v36 }
  0xc1   : > { %v451_v43 = vadd.f32 %v443_v38, %v394_v54  ;;  %v447_v44 = vadd.f32 %v439_v39, %v390_v26 }
  0xc3   : > { %460 = vst.msk [vmem:[%s747_s23 + $0x28] sm:$0xff] %vm454_vm0, %v451_v43 }
  0xc4   : > { %456 = vst.msk [vmem:[%s747_s23 + $0x8] sm:$0xff] %vm454_vm0, %v447_v44  ;;  %v379_v49 = vpop.permute.xlu1 %378 }
  0xc5   : > { %v388_v52 = vmul.f32 %v594_v45, %v379_v49 }
  0xc6   : > { %v432_v47 = vpop.permute.xlu0 %431 }
  0xc7   : > { %v396_v54 = vadd.f32 %v388_v52, %v339_v0  ;;  %v444_v55 = vmul.f32 %v601_v50, %v432_v47 }
  0xc9   : > { %v452_v56 = vadd.f32 %v444_v55, %v395_v53 }
  0xcb   : > { %461 = vst.msk [vmem:[%s747_s23 + $0x30] sm:$0xff] %vm454_vm0, %v452_v56 }
  0xcd   : > { %v416_v57 = vpop.permute.xlu1 %415 }
  0xce   : > { %v440_v58 = vmul.f32 %v597_v33, %v416_v57 }
  0xd0   : > { %v448_v59 = vadd.f32 %v440_v58, %v391_v19 }
  0xd2   : > { %457 = vst.msk [vmem:[%s747_s23 + $0x10] sm:$0xff] %vm454_vm0, %v448_v59 }
  0xd5   : > { %v424_v61 = vpop.permute.xlu1 %423 }
  0xd6   : > { %v442_v62 = vmul.f32 %v599_v60, %v424_v61 }
  0xd8   : > { %v450_v63 = vadd.f32 %v442_v62, %v393_v37 }
  0xda   : > { %459 = vst.msk [vmem:[%s747_s23 + $0x20] sm:$0xff] %vm454_vm0, %v450_v63 }
  0xdd   : > { %v436_v2 = vpop.permute.xlu1 %435 }
  0xde   : > { %v445_v0 = vmul.f32 %v602_v1, %v436_v2 }
  0xe0   : > { %v453_v3 = vadd.f32 %v445_v0, %v396_v54 }
  0xe2   : > { %462 = vst.msk [vmem:[%s747_s23 + $0x38] sm:$0xff] %vm454_vm0, %v453_v3 }
  0xe3 PF: > { %s12_s11 = sadd.s32 1, %s670_s11   ;;  %s796_s9 = smov %s666_s10 }
  0xe4   : > { %p9_p5 = scmp.ge.s32.totalorder %s12_s11, 4   ;;  %s797_s10 = smov %s799_s12 }
  0xe6   :  { %11 = sbr.rel (!%p9_p5) target bundleno = 2 (0x2), region = 64 }

</bundles_post_ra>
